<compile_context>
chip_gen: v5e
topology: v5e:2x2
jax: 0.10.0
libtpu: 0.0.40
codegen_flags: <defaults>
</compile_context>

<pallas_src>
import jax
import jax.numpy as jnp
from jax.experimental import pallas as pl
from jax.experimental.pallas import tpu as pltpu

INPUT_DIM = 20
HIDDEN_DIM = 512
IMBALANCE_FACTOR = 10.0


def _mlp_kernel(x_ref, w1t_ref, w2row_ref, o_ref):
    # fc1 on the MXU, ReLU on the VPU.
    x = x_ref[...]                                            # (TB, IN)
    h = jnp.dot(x, w1t_ref[...],
                preferred_element_type=jnp.float32)           # (TB, H)
    h = jnp.maximum(h, 0.0)                                   # ReLU (act1)
    # fc2 (N=1): VPU multiply with the lane-dense weight row, then a
    # lane-dense epilogue: transpose the weighted activations (XLU has full
    # slack — the fc1 matmul only has K=20) and reduce over the hidden axis,
    # so the per-tile result is a single lane-dense (1, TB) row.  That lowers
    # to unmasked vector stores + a contiguous writeback instead of (TB, 1)
    # masked partial stores.
    hw = h * w2row_ref[...]                                   # (TB, H)
    red = jnp.sum(hw.T, axis=0, keepdims=True)                # (1, TB)
    o_ref[...] = red[None]                                    # (1, 1, TB)


def _round_up(v, m):
    return ((v + m - 1) // m) * m


def nn_toy_imbalanced_forward(x, w1t, w2_row, *, tb=512):
    """relu(x @ w1t) @ w2_row.T, computed in a single fused Pallas kernel."""
    B, in_dim = x.shape

    # ---- pick the batch tile -------------------------------------------
    # Large tiles amortize the ~0.35us/step pipeline overhead (this kernel is
    # step-overhead bound, not compute bound).  Keep tb a multiple of 128 so
    # every tile (including the padded tail) is fully lane/sublane aligned,
    # cap at 2048 for v7x VMEM headroom, and prefer >= 2 grid steps so the
    # "parallel" batch axis shards across both TensorCores on v7x.
    tb_eff = max(128, (min(tb, 2048) // 128) * 128)
    if _round_up(B, 128) >= 2 * 128:
        tb_eff = min(tb_eff, _round_up(pl.cdiv(B, 2), 128))
    else:
        tb_eff = 128

    num_tiles = pl.cdiv(B, tb_eff)
    b_pad = num_tiles * tb_eff

    # Ragged batch: zero-pad (zero rows -> zero outputs, sliced off below).
    if b_pad != B:
        x = jnp.pad(x, ((0, b_pad - B), (0, 0)))

    out_tiles = pl.pallas_call(
        _mlp_kernel,
        out_shape=jax.ShapeDtypeStruct((num_tiles, 1, tb_eff), jnp.float32),
        grid=(num_tiles,),
        in_specs=[
            pl.BlockSpec((tb_eff, in_dim), lambda i: (i, 0)),
            pl.BlockSpec(w1t.shape, lambda i: (0, 0)),      # resident weights
            pl.BlockSpec(w2_row.shape, lambda i: (0, 0)),   # resident weights
        ],
        out_specs=pl.BlockSpec((1, 1, tb_eff), lambda i: (i, 0, 0)),
        compiler_params=pltpu.CompilerParams(
            dimension_semantics=("parallel",)),
    )(x, w1t, w2_row)

    # (num_tiles, 1, tb) in row-major order == batch order -> free view.
    return out_tiles.reshape(b_pad, 1)[:B]


def init_params(key, input_dim=INPUT_DIM, hidden_dim=HIDDEN_DIM,
                imbalance_factor=IMBALANCE_FACTOR):
    """Deterministic xavier_normal_-style init matching the PyTorch module shapes."""
    k1, k2 = jax.random.split(key)
    # fc1.weight: (hidden_dim, input_dim); xavier_normal std = sqrt(2/(fan_in+fan_out))
    std1 = (2.0 / (input_dim + hidden_dim)) ** 0.5
    w1 = jax.random.normal(k1, (hidden_dim, input_dim), jnp.float32) * std1
    w1 = w1 * imbalance_factor
    # fc2.weight: (1, hidden_dim)
    std2 = (2.0 / (hidden_dim + 1)) ** 0.5
    w2 = jax.random.normal(k2, (1, hidden_dim), jnp.float32) * std2
    # fc1 stored transposed (x @ W1.T == x @ W1T); fc2 kept as a lane-dense row.
    return w1.T, w2  # (input_dim, hidden_dim), (1, hidden_dim)


def _reference(x, w1t, w2_row):
    return jnp.maximum(x @ w1t, 0.0) @ w2_row.T


if __name__ == "__main__":
    key = jax.random.PRNGKey(0)
    kx, kp, kb = jax.random.split(key, 3)

    w1t, w2_row = init_params(kp)

    # Small batch: single padded tile.
    B_small = 8
    x_small = jax.random.normal(kx, (B_small, INPUT_DIM), jnp.float32)
    out_small = jax.block_until_ready(
        nn_toy_imbalanced_forward(x_small, w1t, w2_row))
    ref_small = _reference(x_small, w1t, w2_row)
    assert out_small.shape == (B_small, 1)
    assert jnp.allclose(out_small, ref_small, atol=1e-3, rtol=1e-3)

    # Ragged, larger batch: multi-tile path with zero-padded tail,
    # resident weights and a parallel batch axis.
    B_big = 200
    x_big = jax.random.normal(kb, (B_big, INPUT_DIM), jnp.float32)
    out_big = jax.block_until_ready(
        nn_toy_imbalanced_forward(x_big, w1t, w2_row, tb=512))
    ref_big = _reference(x_big, w1t, w2_row)
    assert out_big.shape == (B_big, 1)
    assert jnp.allclose(out_big, ref_big, atol=1e-3, rtol=1e-3)

    # TODO(synk): ActivationSparsityHook (training-time Python forward hook that
    # records ReLU sparsity) and the __init__-time weight-norm print are
    # host-side / stateful and are not part of the numerical forward path, so
    # they are not reproduced inside the kernel.

    print("KERNEL_OK")
</pallas_src>

<mosaic_0001>
module attributes {stable_mosaic.version = 11 : i64} {
  func.func @_mlp_kernel(%arg0: i32, %arg1: memref<128x20xf32, #tpu.memory_space<vmem>>, %arg2: memref<20x512xf32, #tpu.memory_space<vmem>>, %arg3: memref<1x512xf32, #tpu.memory_space<vmem>>, %arg4: memref<1x1x128xf32, #tpu.memory_space<vmem>>) attributes {dimension_semantics = [#tpu.dimension_semantics<parallel>], iteration_bounds = array<i64: 1>, scalar_prefetch = 0 : i64, scratch_operands = 0 : i64, tpu.core_type = #tpu.core_type<tc>, window_params = [{transform_indices = @transform_0, window_bounds = array<i64: 128, 20>}, {pipeline_mode = #tpu.pipeline_mode<synchronous>, transform_indices = @transform_1, window_bounds = array<i64: 20, 512>}, {pipeline_mode = #tpu.pipeline_mode<synchronous>, transform_indices = @transform_2, window_bounds = array<i64: 1, 512>}, {transform_indices = @transform_3, window_bounds = array<i64: 1, 1, 128>}]} {
    %c0 = arith.constant 0 : index
    %c0_0 = arith.constant 0 : index
    %0 = vector.load %arg1[%c0, %c0_0] : memref<128x20xf32, #tpu.memory_space<vmem>>, vector<128x20xf32>
    %c0_1 = arith.constant 0 : index
    %c0_2 = arith.constant 0 : index
    %1 = vector.load %arg2[%c0_1, %c0_2] : memref<20x512xf32, #tpu.memory_space<vmem>>, vector<20x512xf32>
    %cst = arith.constant dense<0.000000e+00> : vector<128x512xf32>
    %2 = tpu.matmul %0, %1, %cst {dimension_numbers = #tpu.dot_dimension_numbers<[1], [0], [0], [1], [0, 0, 1, 1], [], []>} : vector<128x20xf32>, vector<20x512xf32>, vector<128x512xf32> -> vector<128x512xf32>
    %cst_3 = arith.constant 0.000000e+00 : f32
    %3 = vector.broadcast %cst_3 : f32 to vector<128x512xf32>
    %4 = arith.maximumf %2, %3 : vector<128x512xf32>
    %c0_4 = arith.constant 0 : index
    %c0_5 = arith.constant 0 : index
    %5 = vector.load %arg3[%c0_4, %c0_5] : memref<1x512xf32, #tpu.memory_space<vmem>>, vector<1x512xf32>
    %6 = vector.broadcast %5 : vector<1x512xf32> to vector<128x512xf32>
    %7 = arith.mulf %4, %6 : vector<128x512xf32>
    %8 = tpu.transpose %7, [1, 0] : vector<128x512xf32> -> vector<512x128xf32>
    %cst_6 = arith.constant dense<0.000000e+00> : vector<128xf32>
    %9 = vector.multi_reduction <add>, %8, %cst_6 [0] : vector<512x128xf32> to vector<128xf32>
    %10 = vector.shape_cast %9 : vector<128xf32> to vector<1x128xf32>
    %11 = vector.shape_cast %10 : vector<1x128xf32> to vector<1x1x128xf32>
    %c0_7 = arith.constant 0 : index
    %c0_8 = arith.constant 0 : index
    %c0_9 = arith.constant 0 : index
    %12 = vector.load %arg4[%c0_7, %c0_8, %c0_9] : memref<1x1x128xf32, #tpu.memory_space<vmem>>, vector<1x1x128xf32>
    tpu.vector_store %arg4[%c0_7, %c0_8, %c0_9], %11 {strides = array<i32>} : memref<1x1x128xf32, #tpu.memory_space<vmem>>, vector<1x1x128xf32>,
    return
  }
  func.func @transform_0(%arg0: i32) -> (i32, i32) {
    %c0_i32 = arith.constant 0 : i32
    %c0_i32_0 = arith.constant 0 : i32
    return %arg0, %c0_i32 : i32, i32
  }
  func.func @transform_1(%arg0: i32) -> (i32, i32) {
    %c0_i32 = arith.constant 0 : i32
    %c0_i32_0 = arith.constant 0 : i32
    %c0_i32_1 = arith.constant 0 : i32
    return %c0_i32, %c0_i32_0 : i32, i32
  }
  func.func @transform_2(%arg0: i32) -> (i32, i32) {
    %c0_i32 = arith.constant 0 : i32
    %c0_i32_0 = arith.constant 0 : i32
    %c0_i32_1 = arith.constant 0 : i32
    return %c0_i32, %c0_i32_0 : i32, i32
  }
  func.func @transform_3(%arg0: i32) -> (i32, i32, i32) {
    %c0_i32 = arith.constant 0 : i32
    %c0_i32_0 = arith.constant 0 : i32
    %c0_i32_1 = arith.constant 0 : i32
    return %arg0, %c0_i32, %c0_i32_0 : i32, i32, i32
  }
}

</mosaic_0001>

<bundles_post_ra>
// kernel: tpu_custom_call.1
= control target key start
LH: loop header
LB: loop body
LE: loop exit
PB: predicated region body
PF: predicated region fallthrough
CT: control target
= control target key end

     0   :  { %vm92_vm0 = vcmask 1043456   ;;  %vm43_vm1 = vcmask 162816   ;;  %s1168_s0 = inlined_call_operand.vmem [shape: f32[128,20], index: 0, kind: input, shape index: {}]   ;;  %s1169_s1 = inlined_call_operand.vmem [shape: f32[20,512], index: 1, kind: input, shape index: {}]   ;;  %s1170_s2 = inlined_call_operand.vmem [shape: f32[1,512], index: 2, kind: input, shape index: {}]   ;;  %s1171_s3 = inlined_call_operand.hbm [shape: f32[1,1,128], index: 3, kind: output, shape index: {}]  }
   0x1   :  { %v39_v0 = vld [vmem:[%s1169_s1 + $0x40] sm:$0xf]  ;;  %v40_v3 = vld [vmem:[%s1169_s1 + $0x48] sm:$0xf] }
   0x2   :  { %v35_v1 = vld [vmem:[%s1169_s1 + $0x20] sm:$0xff]  ;;  %717 = vmatpush.msk.msra.mxu0 %vm92_vm0, %v39_v0  ;;  %v36_v4 = vld [vmem:[%s1169_s1 + $0x28] sm:$0xff]  ;;  %734 = vmatpush.msk.msra.mxu1 %vm92_vm0, %v40_v3 }
   0x3   :  { %v31_v2 = vld [vmem:[%s1169_s1] sm:$0xff] }
   0x4   :  { %119 = vmatpush.msra.mxu0 %v35_v1  ;;  %v15_v5 = vld [vmem:[%s1168_s0] sm:$0xff] }
   0x5   :  { %8 = vsyncpa [#allocation3], 0  ;;  %v32_v6 = vld [vmem:[%s1169_s1 + $0x8] sm:$0xff]  ;;  %184 = vmatpush.msra.mxu1 %v36_v4  ;;  %v17_v8 = vld [vmem:[%s1168_s0 + $0x10] sm:$0xff]  ;;  %s708_s17 = sshll.u32 %s1171_s3, 4  ;;  %s709_s17 = int_to_ptr.hbm [resolvable:$true] %s708_s17 }
   0x6   :  { %120 = vmatpush.msra.mxu0 %v31_v2  ;;  %v16_v7 = vld [vmem:[%s1168_s0 + $0x8] sm:$0xff]  ;;  %v18_v9 = vld [vmem:[%s1168_s0 + $0x18] sm:$0xff]  ;;  %v876_v10 = vld [vmem:[%s1168_s0 + $0x20] sm:$0xff] }
   0x7   :  { %718 = vmatmul.msk.f32.vlgmr.msra.gmra.mxu0 %vm43_vm1, %v15_v5  ;;  %185 = vmatpush.msra.mxu1 %v32_v6  ;;  %v41_v11 = vld [vmem:[%s1169_s1 + $0x50] sm:$0xf]  ;;  %v895_v14 = vld [vmem:[%s1168_s0 + $0x28] sm:$0xff]  ;;  %v915_v16 = vld [vmem:[%s1168_s0 + $0x38] sm:$0xff] }
   0x8   :  { %735 = vmatmul.msk.f32.vlgmr.msra.gmra.mxu1 %vm43_vm1, %v15_v5  ;;  %751 = vmatpush.msk.msra.mxu2 %vm92_vm0, %v41_v11  ;;  %v37_v12 = vld [vmem:[%s1169_s1 + $0x30] sm:$0xff]  ;;  %v925_v17 = vld [vmem:[%s1168_s0 + $0x40] sm:$0xff]  ;;  %v935_v18 = vld [vmem:[%s1168_s0 + $0x48] sm:$0xff] }
   0x9   :  { %v33_v13 = vld [vmem:[%s1169_s1 + $0x10] sm:$0xff]  ;;  %v42_v20 = vld [vmem:[%s1169_s1 + $0x58] sm:$0xf]  ;;  %v979_v24 = vld [vmem:[%s1168_s0 + $0x60] sm:$0xff] }
   0xa   :  { %249 = vmatpush.msra.mxu2 %v37_v12  ;;  %v905_v15 = vld [vmem:[%s1168_s0 + $0x30] sm:$0xff]  ;;  %v38_v21 = vld [vmem:[%s1169_s1 + $0x38] sm:$0xff]  ;;  %768 = vmatpush.msk.msra.mxu3 %vm92_vm0, %v42_v20  ;;  %v991_v25 = vld [vmem:[%s1168_s0 + $0x68] sm:$0xff] }
   0xb   :  { %v946_v19 = vld [vmem:[%s1168_s0 + $0x50] sm:$0xff]  ;;  %v964_v22 = vld [vmem:[%s1168_s0 + $0x58] sm:$0xff]  ;;  %v1024_v28 = vld [vmem:[%s1170_s2] sm:$0xf] }
   0xc   :  { %250 = vmatpush.msra.mxu2 %v33_v13  ;;  %314 = vmatpush.msra.mxu3 %v38_v21  ;;  %v34_v23 = vld [vmem:[%s1169_s1 + $0x18] sm:$0xff]  ;;  %v1003_v26 = vld [vmem:[%s1168_s0 + $0x70] sm:$0xff]  ;;  %v1031_v29 = vperm.slane %v1024_v28, 0  ;;  %v1036_v32 = vperm.slane %v1024_v28, 1  ;;  %v1068_v4 = vperm.slane %v1024_v28, 2 }
   0xd   :  { %752 = vmatmul.msk.f32.vlgmr.msra.gmra.mxu2 %vm43_vm1, %v15_v5  ;;  %v1015_v27 = vld [vmem:[%s1168_s0 + $0x78] sm:$0xff]  ;;  %s812_s0 = smov [#allocation2]  }
   0xe   :  { %315 = vmatpush.msra.mxu3 %v34_v23  ;;  %s706_s2 = sshll.u32 %s812_s0, 4  ;;  %s707_s2 = int_to_ptr.vmem [resolvable:$true] %s706_s2 }
   0xf   :  { %719 = vmatmul.msk.f32.gmra.mxu0 %vm43_vm1, %v16_v7  ;;  %769 = vmatmul.msk.f32.vlgmr.msra.gmra.mxu3 %vm43_vm1, %v15_v5 }
  0x10   :  { %736 = vmatmul.msk.f32.gmra.mxu1 %vm43_vm1, %v16_v7 }
  0x15   :  { %753 = vmatmul.msk.f32.gmra.mxu2 %vm43_vm1, %v16_v7 }
  0x17   :  { %720 = vmatmul.msk.f32.gmra.mxu0 %vm43_vm1, %v17_v8  ;;  %770 = vmatmul.msk.f32.gmra.mxu3 %vm43_vm1, %v16_v7 }
  0x18   :  { %737 = vmatmul.msk.f32.gmra.mxu1 %vm43_vm1, %v17_v8 }
  0x1d   :  { %754 = vmatmul.msk.f32.gmra.mxu2 %vm43_vm1, %v17_v8 }
  0x1f   :  { %721 = vmatmul.msk.f32.gmra.mxu0 %vm43_vm1, %v18_v9  ;;  %771 = vmatmul.msk.f32.gmra.mxu3 %vm43_vm1, %v17_v8 }
  0x20   :  { %738 = vmatmul.msk.f32.gmra.mxu1 %vm43_vm1, %v18_v9 }
  0x25   :  { %755 = vmatmul.msk.f32.gmra.mxu2 %vm43_vm1, %v18_v9 }
  0x27   :  { %722 = vmatmul.msk.f32.gmra.mxu0 %vm43_vm1, %v876_v10  ;;  %772 = vmatmul.msk.f32.gmra.mxu3 %vm43_vm1, %v18_v9 }
  0x28   :  { %739 = vmatmul.msk.f32.gmra.mxu1 %vm43_vm1, %v876_v10 }
  0x2d   :  { %756 = vmatmul.msk.f32.gmra.mxu2 %vm43_vm1, %v876_v10 }
  0x2f   :  { %723 = vmatmul.msk.f32.gmra.mxu0 %vm43_vm1, %v895_v14  ;;  %773 = vmatmul.msk.f32.gmra.mxu3 %vm43_vm1, %v876_v10 }
  0x30   :  { %740 = vmatmul.msk.f32.gmra.mxu1 %vm43_vm1, %v895_v14 }
  0x35   :  { %757 = vmatmul.msk.f32.gmra.mxu2 %vm43_vm1, %v895_v14 }
  0x37   :  { %724 = vmatmul.msk.f32.gmra.mxu0 %vm43_vm1, %v905_v15  ;;  %774 = vmatmul.msk.f32.gmra.mxu3 %vm43_vm1, %v895_v14 }
  0x38   :  { %741 = vmatmul.msk.f32.gmra.mxu1 %vm43_vm1, %v905_v15 }
  0x3d   :  { %758 = vmatmul.msk.f32.gmra.mxu2 %vm43_vm1, %v905_v15 }
  0x3f   :  { %725 = vmatmul.msk.f32.gmra.mxu0 %vm43_vm1, %v915_v16  ;;  %775 = vmatmul.msk.f32.gmra.mxu3 %vm43_vm1, %v905_v15 }
  0x40   :  { %742 = vmatmul.msk.f32.gmra.mxu1 %vm43_vm1, %v915_v16 }
  0x45   :  { %759 = vmatmul.msk.f32.gmra.mxu2 %vm43_vm1, %v915_v16 }
  0x47   :  { %726 = vmatmul.msk.f32.gmra.mxu0 %vm43_vm1, %v925_v17  ;;  %776 = vmatmul.msk.f32.gmra.mxu3 %vm43_vm1, %v915_v16 }
  0x48   :  { %743 = vmatmul.msk.f32.gmra.mxu1 %vm43_vm1, %v925_v17 }
  0x4d   :  { %760 = vmatmul.msk.f32.gmra.mxu2 %vm43_vm1, %v925_v17 }
  0x4f   :  { %727 = vmatmul.msk.f32.gmra.mxu0 %vm43_vm1, %v935_v18  ;;  %777 = vmatmul.msk.f32.gmra.mxu3 %vm43_vm1, %v925_v17 }
  0x50   :  { %744 = vmatmul.msk.f32.gmra.mxu1 %vm43_vm1, %v935_v18 }
  0x55   :  { %761 = vmatmul.msk.f32.gmra.mxu2 %vm43_vm1, %v935_v18 }
  0x57   :  { %728 = vmatmul.msk.f32.gmra.mxu0 %vm43_vm1, %v946_v19  ;;  %778 = vmatmul.msk.f32.gmra.mxu3 %vm43_vm1, %v935_v18 }
  0x58   :  { %745 = vmatmul.msk.f32.gmra.mxu1 %vm43_vm1, %v946_v19 }
  0x5d   :  { %762 = vmatmul.msk.f32.gmra.mxu2 %vm43_vm1, %v946_v19 }
  0x5f   :  { %729 = vmatmul.msk.f32.gmra.mxu0 %vm43_vm1, %v964_v22  ;;  %779 = vmatmul.msk.f32.gmra.mxu3 %vm43_vm1, %v946_v19 }
  0x60   :  { %746 = vmatmul.msk.f32.gmra.mxu1 %vm43_vm1, %v964_v22 }
  0x65   :  { %763 = vmatmul.msk.f32.gmra.mxu2 %vm43_vm1, %v964_v22 }
  0x67   :  { %730 = vmatmul.msk.f32.gmra.mxu0 %vm43_vm1, %v979_v24  ;;  %780 = vmatmul.msk.f32.gmra.mxu3 %vm43_vm1, %v964_v22 }
  0x68   :  { %747 = vmatmul.msk.f32.gmra.mxu1 %vm43_vm1, %v979_v24 }
  0x6d   :  { %764 = vmatmul.msk.f32.gmra.mxu2 %vm43_vm1, %v979_v24 }
  0x6f   :  { %731 = vmatmul.msk.f32.gmra.mxu0 %vm43_vm1, %v991_v25  ;;  %781 = vmatmul.msk.f32.gmra.mxu3 %vm43_vm1, %v979_v24 }
  0x70   :  { %748 = vmatmul.msk.f32.gmra.mxu1 %vm43_vm1, %v991_v25 }
  0x75   :  { %765 = vmatmul.msk.f32.gmra.mxu2 %vm43_vm1, %v991_v25 }
  0x77   :  { %732 = vmatmul.msk.f32.gmra.mxu0 %vm43_vm1, %v1003_v26  ;;  %782 = vmatmul.msk.f32.gmra.mxu3 %vm43_vm1, %v991_v25 }
  0x78   :  { %749 = vmatmul.msk.f32.gmra.mxu1 %vm43_vm1, %v1003_v26 }
  0x7d   :  { %766 = vmatmul.msk.f32.gmra.mxu2 %vm43_vm1, %v1003_v26 }
  0x7f   :  { %733 = vmatmul.msk.f32.gmra.mxu0 %vm43_vm1, %v1015_v27  ;;  %783 = vmatmul.msk.f32.gmra.mxu3 %vm43_vm1, %v1003_v26 }
  0x80   :  { %750 = vmatmul.msk.f32.gmra.mxu1 %vm43_vm1, %v1015_v27 }
  0x84   :  { %v122_v30 = vpop.f32.mrf.mxu0 }
  0x85   :  { %v365_v31 = vmax.f32 %v122_v30, 0.0  ;;  %v187_v33 = vpop.f32.mrf.mxu1  ;;  %767 = vmatmul.msk.f32.gmra.mxu2 %vm43_vm1, %v1015_v27 }
  0x86   :  { %v366_v35 = vmax.f32 %v187_v33, 0.0 }
  0x87   :  { %v439_v34 = vmul.f32 %v1031_v29, %v365_v31  ;;  %784 = vmatmul.msk.f32.gmra.mxu3 %vm43_vm1, %v1015_v27 }
  0x88   :  { %v440_v36 = vmul.f32 %v1036_v32, %v366_v35 }
  0x89   :  { %503 = vxpose.xlu0.b32.start [1/16] %v439_v34, 128 }
  0x8a   :  { %535 = vxpose.xlu1.b32.start [1/16] %v440_v36, 128 }
  0x8c   :  { %v125_v37 = vpop.f32.mrf.mxu0 }
  0x8d   :  { %v369_v38 = vmax.f32 %v125_v37, 0.0  ;;  %v190_v39 = vpop.f32.mrf.mxu1 }
  0x8e   :  { %v370_v41 = vmax.f32 %v190_v39, 0.0 }
  0x8f   :  { %v443_v40 = vmul.f32 %v1031_v29, %v369_v38 }
  0x90   :  { %v444_v42 = vmul.f32 %v1036_v32, %v370_v41  ;;  %v252_v2 = vpop.f32.mrf.mxu2 }
  0x91   :  { %504 = vxpose.xlu0.b32.cont [2/16] %v443_v40, 128  ;;  %v367_v3 = vmax.f32 %v252_v2, 0.0 }
  0x92   :  { %536 = vxpose.xlu1.b32.cont [2/16] %v444_v42, 128 }
  0x93   :  { %v441_v6 = vmul.f32 %v1068_v4, %v367_v3 }
  0x94   :  { %v128_v43 = vpop.f32.mrf.mxu0 }
  0x95   :  { %v373_v44 = vmax.f32 %v128_v43, 0.0  ;;  %v193_v45 = vpop.f32.mrf.mxu1  ;;  %567 = vxpose.xlu2.b32.start [1/16] %v441_v6, 128 }
  0x96   :  { %v374_v47 = vmax.f32 %v193_v45, 0.0 }
  0x97   :  { %v447_v46 = vmul.f32 %v1031_v29, %v373_v44 }
  0x98   :  { %v448_v48 = vmul.f32 %v1036_v32, %v374_v47  ;;  %v255_v12 = vpop.f32.mrf.mxu2 }
  0x99   :  { %505 = vxpose.xlu0.b32.cont [3/16] %v447_v46, 128  ;;  %v371_v13 = vmax.f32 %v255_v12, 0.0 }
  0x9a   :  { %537 = vxpose.xlu1.b32.cont [3/16] %v448_v48, 128 }
  0x9b   :  { %v445_v15 = vmul.f32 %v1068_v4, %v371_v13 }
  0x9c   :  { %v131_v49 = vpop.f32.mrf.mxu0 }
  0x9d   :  { %v377_v50 = vmax.f32 %v131_v49, 0.0  ;;  %v196_v51 = vpop.f32.mrf.mxu1  ;;  %568 = vxpose.xlu2.b32.cont [2/16] %v445_v15, 128 }
  0x9e   :  { %v378_v53 = vmax.f32 %v196_v51, 0.0 }
  0x9f   :  { %v451_v52 = vmul.f32 %v1031_v29, %v377_v50 }
  0xa0   :  { %v452_v54 = vmul.f32 %v1036_v32, %v378_v53  ;;  %v258_v21 = vpop.f32.mrf.mxu2 }
  0xa1   :  { %506 = vxpose.xlu0.b32.cont [4/16] %v451_v52, 128  ;;  %v375_v23 = vmax.f32 %v258_v21, 0.0 }
  0xa2   :  { %538 = vxpose.xlu1.b32.cont [4/16] %v452_v54, 128 }
  0xa3   :  { %v449_v30 = vmul.f32 %v1068_v4, %v375_v23 }
  0xa4   :  { %v134_v55 = vpop.f32.mrf.mxu0 }
  0xa5   :  { %v381_v56 = vmax.f32 %v134_v55, 0.0  ;;  %v199_v57 = vpop.f32.mrf.mxu1  ;;  %569 = vxpose.xlu2.b32.cont [3/16] %v449_v30, 128 }
  0xa6   :  { %v382_v59 = vmax.f32 %v199_v57, 0.0 }
  0xa7   :  { %v455_v58 = vmul.f32 %v1031_v29, %v381_v56 }
  0xa8   :  { %v456_v60 = vmul.f32 %v1036_v32, %v382_v59  ;;  %v261_v37 = vpop.f32.mrf.mxu2 }
  0xa9   :  { %507 = vxpose.xlu0.b32.cont [5/16] %v455_v58, 128  ;;  %v379_v38 = vmax.f32 %v261_v37, 0.0 }
  0xaa   :  { %539 = vxpose.xlu1.b32.cont [5/16] %v456_v60, 128 }
  0xab   :  { %v453_v39 = vmul.f32 %v1068_v4, %v379_v38 }
  0xac   :  { %v137_v61 = vpop.f32.mrf.mxu0 }
  0xad   :  { %v385_v62 = vmax.f32 %v137_v61, 0.0  ;;  %v202_v63 = vpop.f32.mrf.mxu1  ;;  %570 = vxpose.xlu2.b32.cont [4/16] %v453_v39, 128 }
  0xae   :  { %v386_v1 = vmax.f32 %v202_v63, 0.0 }
  0xaf   :  { %v459_v0 = vmul.f32 %v1031_v29, %v385_v62 }
  0xb0   :  { %v460_v5 = vmul.f32 %v1036_v32, %v386_v1  ;;  %v264_v45 = vpop.f32.mrf.mxu2  ;;  %v317_v1 = vpop.f32.mrf.mxu3 }
  0xb1   :  { %508 = vxpose.xlu0.b32.cont [6/16] %v459_v0, 128  ;;  %v383_v46 = vmax.f32 %v264_v45, 0.0  ;;  %v368_v45 = vmax.f32 %v317_v1, 0.0 }
  0xb2   :  { %540 = vxpose.xlu1.b32.cont [6/16] %v460_v5, 128 }
  0xb3   :  { %v457_v47 = vmul.f32 %v1068_v4, %v383_v46  ;;  %v1113_v46 = vperm.slane %v1024_v28, 3 }
  0xb4   :  { %v140_v7 = vpop.f32.mrf.mxu0 }
  0xb5   :  { %v389_v8 = vmax.f32 %v140_v7, 0.0  ;;  %v205_v9 = vpop.f32.mrf.mxu1  ;;  %571 = vxpose.xlu2.b32.cont [5/16] %v457_v47, 128 }
  0xb6   :  { %v390_v11 = vmax.f32 %v205_v9, 0.0 }
  0xb7   :  { %v463_v10 = vmul.f32 %v1031_v29, %v389_v8 }
  0xb8   :  { %v464_v14 = vmul.f32 %v1036_v32, %v390_v11  ;;  %v267_v53 = vpop.f32.mrf.mxu2  ;;  %v320_v12 = vpop.f32.mrf.mxu3 }
  0xb9   :  { %509 = vxpose.xlu0.b32.cont [7/16] %v463_v10, 128  ;;  %v387_v54 = vmax.f32 %v267_v53, 0.0 }
  0xba   :  { %541 = vxpose.xlu1.b32.cont [7/16] %v464_v14, 128 }
  0xbb   :  { %v461_v55 = vmul.f32 %v1068_v4, %v387_v54 }
  0xbc   :  { %v143_v16 = vpop.f32.mrf.mxu0 }
  0xbd   :  { %v393_v17 = vmax.f32 %v143_v16, 0.0  ;;  %v208_v18 = vpop.f32.mrf.mxu1  ;;  %572 = vxpose.xlu2.b32.cont [6/16] %v461_v55, 128 }
  0xbe   :  { %v394_v20 = vmax.f32 %v208_v18, 0.0 }
  0xbf   :  { %v467_v19 = vmul.f32 %v1031_v29, %v393_v17 }
  0xc0   :  { %v468_v22 = vmul.f32 %v1036_v32, %v394_v20  ;;  %v270_v61 = vpop.f32.mrf.mxu2  ;;  %v323_v23 = vpop.f32.mrf.mxu3 }
  0xc1   :  { %510 = vxpose.xlu0.b32.cont [8/16] %v467_v19, 128  ;;  %v391_v62 = vmax.f32 %v270_v61, 0.0 }
  0xc2   :  { %542 = vxpose.xlu1.b32.cont [8/16] %v468_v22, 128 }
  0xc3   :  { %v465_v0 = vmul.f32 %v1068_v4, %v391_v62 }
  0xc4   :  { %v146_v31 = vpop.f32.mrf.mxu0 }
  0xc5   :  { %v397_v33 = vmax.f32 %v146_v31, 0.0  ;;  %v211_v34 = vpop.f32.mrf.mxu1  ;;  %573 = vxpose.xlu2.b32.cont [7/16] %v465_v0, 128 }
  0xc6   :  { %v398_v36 = vmax.f32 %v211_v34, 0.0 }
  0xc7   :  { %v471_v35 = vmul.f32 %v1031_v29, %v397_v33 }
  0xc8   :  { %v472_v24 = vmul.f32 %v1036_v32, %v398_v36  ;;  %v273_v7 = vpop.f32.mrf.mxu2  ;;  %v326_v39 = vpop.f32.mrf.mxu3 }
  0xc9   :  { %511 = vxpose.xlu0.b32.cont [9/16] %v471_v35, 128  ;;  %v395_v8 = vmax.f32 %v273_v7, 0.0 }
  0xca   :  { %543 = vxpose.xlu1.b32.cont [9/16] %v472_v24, 128 }
  0xcb   :  { %v469_v10 = vmul.f32 %v1068_v4, %v395_v8 }
  0xcc   :  { %v149_v40 = vpop.f32.mrf.mxu0 }
  0xcd   :  { %v401_v41 = vmax.f32 %v149_v40, 0.0  ;;  %v214_v42 = vpop.f32.mrf.mxu1  ;;  %574 = vxpose.xlu2.b32.cont [8/16] %v469_v10, 128 }
  0xce   :  { %v402_v44 = vmax.f32 %v214_v42, 0.0 }
  0xcf   :  { %v475_v43 = vmul.f32 %v1031_v29, %v401_v41 }
  0xd0   :  { %v476_v25 = vmul.f32 %v1036_v32, %v402_v44  ;;  %v276_v17 = vpop.f32.mrf.mxu2 }
  0xd1   :  { %512 = vxpose.xlu0.b32.cont [10/16] %v475_v43, 128  ;;  %v399_v18 = vmax.f32 %v276_v17, 0.0 }
  0xd2   :  { %544 = vxpose.xlu1.b32.cont [10/16] %v476_v25, 128 }
  0xd3   :  { %v473_v20 = vmul.f32 %v1068_v4, %v399_v18 }
  0xd4   :  { %v152_v48 = vpop.f32.mrf.mxu0 }
  0xd5   :  { %v405_v49 = vmax.f32 %v152_v48, 0.0  ;;  %v217_v50 = vpop.f32.mrf.mxu1  ;;  %575 = vxpose.xlu2.b32.cont [9/16] %v473_v20, 128  ;;  %v442_v48 = vmul.f32 %v1113_v46, %v368_v45 }
  0xd6   :  { %v406_v52 = vmax.f32 %v217_v50, 0.0  ;;  %v329_v50 = vpop.f32.mrf.mxu3 }
  0xd7   :  { %v479_v51 = vmul.f32 %v1031_v29, %v405_v49 }
  0xd8   :  { %v480_v26 = vmul.f32 %v1036_v32, %v406_v52  ;;  %v279_v34 = vpop.f32.mrf.mxu2 }
  0xd9   :  { %513 = vxpose.xlu0.b32.cont [11/16] %v479_v51, 128  ;;  %v403_v35 = vmax.f32 %v279_v34, 0.0 }
  0xda   :  { %545 = vxpose.xlu1.b32.cont [11/16] %v480_v26, 128 }
  0xdb   :  { %v477_v37 = vmul.f32 %v1068_v4, %v403_v35 }
  0xdc   :  { %v155_v56 = vpop.f32.mrf.mxu0 }
  0xdd   :  { %v409_v57 = vmax.f32 %v155_v56, 0.0  ;;  %v220_v58 = vpop.f32.mrf.mxu1  ;;  %576 = vxpose.xlu2.b32.cont [10/16] %v477_v37, 128 }
  0xde   :  { %v410_v60 = vmax.f32 %v220_v58, 0.0  ;;  %v332_v26 = vpop.f32.mrf.mxu3 }
  0xdf   :  { %v483_v59 = vmul.f32 %v1031_v29, %v409_v57  ;;  %v388_v7 = vmax.f32 %v332_v26, 0.0 }
  0xe0   :  { %v484_v63 = vmul.f32 %v1036_v32, %v410_v60  ;;  %v282_v43 = vpop.f32.mrf.mxu2 }
  0xe1   :  { %514 = vxpose.xlu0.b32.cont [12/16] %v483_v59, 128  ;;  %v407_v44 = vmax.f32 %v282_v43, 0.0  ;;  %v380_v59 = vmax.f32 %v326_v39, 0.0 }
  0xe2   :  { %546 = vxpose.xlu1.b32.cont [12/16] %v484_v63, 128 }
  0xe3   :  { %v481_v47 = vmul.f32 %v1068_v4, %v407_v44  ;;  %v454_v62 = vmul.f32 %v1113_v46, %v380_v59 }
  0xe4   :  { %v158_v27 = vpop.f32.mrf.mxu0 }
  0xe5   :  { %v413_v2 = vmax.f32 %v158_v27, 0.0  ;;  %v223_v3 = vpop.f32.mrf.mxu1  ;;  %577 = vxpose.xlu2.b32.cont [11/16] %v481_v47, 128  ;;  %v384_v27 = vmax.f32 %v329_v50, 0.0 }
  0xe6   :  { %v414_v6 = vmax.f32 %v223_v3, 0.0  ;;  %v335_v61 = vpop.f32.mrf.mxu3 }
  0xe7   :  { %v487_v5 = vmul.f32 %v1031_v29, %v413_v2  ;;  %v458_v2 = vmul.f32 %v1113_v46, %v384_v27 }
  0xe8   :  { %v488_v9 = vmul.f32 %v1036_v32, %v414_v6  ;;  %v285_v49 = vpop.f32.mrf.mxu2 }
  0xe9   :  { %515 = vxpose.xlu0.b32.cont [13/16] %v487_v5, 128  ;;  %v411_v51 = vmax.f32 %v285_v49, 0.0 }
  0xea   :  { %547 = vxpose.xlu1.b32.cont [13/16] %v488_v9, 128  ;;  %v462_v9 = vmul.f32 %v1113_v46, %v388_v7 }
  0xeb   :  { %v485_v52 = vmul.f32 %v1068_v4, %v411_v51 }
  0xec   :  { %v161_v11 = vpop.f32.mrf.mxu0 }
  0xed   :  { %v417_v13 = vmax.f32 %v161_v11, 0.0  ;;  %v226_v14 = vpop.f32.mrf.mxu1  ;;  %578 = vxpose.xlu2.b32.cont [12/16] %v485_v52, 128 }
  0xee   :  { %v418_v16 = vmax.f32 %v226_v14, 0.0  ;;  %v338_v3 = vpop.f32.mrf.mxu3 }
  0xef   :  { %v491_v15 = vmul.f32 %v1031_v29, %v417_v13  ;;  %v392_v13 = vmax.f32 %v335_v61, 0.0  ;;  %v396_v18 = vmax.f32 %v338_v3, 0.0 }
  0xf0   :  { %v492_v19 = vmul.f32 %v1036_v32, %v418_v16  ;;  %v288_v28 = vpop.f32.mrf.mxu2 }
  0xf1   :  { %516 = vxpose.xlu0.b32.cont [14/16] %v491_v15, 128  ;;  %v415_v54 = vmax.f32 %v288_v28, 0.0  ;;  %v466_v14 = vmul.f32 %v1113_v46, %v392_v13 }
  0xf2   :  { %548 = vxpose.xlu1.b32.cont [14/16] %v492_v19, 128 }
  0xf3   :  { %v489_v55 = vmul.f32 %v1068_v4, %v415_v54 }
  0xf4   :  { %v164_v21 = vpop.f32.mrf.mxu0 }
  0xf5   :  { %v421_v22 = vmax.f32 %v164_v21, 0.0  ;;  %v229_v30 = vpop.f32.mrf.mxu1  ;;  %579 = vxpose.xlu2.b32.cont [13/16] %v489_v55, 128 }
  0xf6   :  { %v422_v33 = vmax.f32 %v229_v30, 0.0 }
  0xf7   :  { %v495_v31 = vmul.f32 %v1031_v29, %v421_v22 }
  0xf8   :  { %v496_v36 = vmul.f32 %v1036_v32, %v422_v33  ;;  %v291_v57 = vpop.f32.mrf.mxu2 }
  0xf9   :  { %517 = vxpose.xlu0.b32.cont [15/16] %v495_v31, 128  ;;  %v419_v58 = vmax.f32 %v291_v57, 0.0 }
  0xfa   :  { %549 = vxpose.xlu1.b32.cont [15/16] %v496_v36, 128 }
  0xfb   :  { %v493_v60 = vmul.f32 %v1068_v4, %v419_v58 }
  0xfc   :  { %v167_v38 = vpop.f32.mrf.mxu0 }
  0xfd   :  { %v425_v24 = vmax.f32 %v167_v38, 0.0  ;;  %v232_v40 = vpop.f32.mrf.mxu1  ;;  %580 = vxpose.xlu2.b32.cont [14/16] %v493_v60, 128 }
  0xfe   :  { %v426_v42 = vmax.f32 %v232_v40, 0.0 }
  0xff   :  { %v499_v41 = vmul.f32 %v1031_v29, %v425_v24  ;;  %v372_v29 = vmax.f32 %v320_v12, 0.0  ;;  %v341_v12 = vpop.f32.mrf.mxu3 }
 0x100   :  { %v500_v25 = vmul.f32 %v1036_v32, %v426_v42  ;;  %v376_v32 = vmax.f32 %v323_v23, 0.0  ;;  %v294_v63 = vpop.f32.mrf.mxu2  ;;  %v400_v23 = vmax.f32 %v341_v12, 0.0 }
 0x101   :  { %518 = vxpose.xlu0.b32.end [16/16] %v499_v41, 128  ;;  %v446_v53 = vmul.f32 %v1113_v46, %v372_v29  ;;  %v423_v0 = vmax.f32 %v294_v63, 0.0 }
 0x102   :  { %550 = vxpose.xlu1.b32.end [16/16] %v500_v25, 128  ;;  %v450_v56 = vmul.f32 %v1113_v46, %v376_v32  ;;  %v474_v31 = vmul.f32 %v1113_v46, %v400_v23 }
 0x103   :  { %v497_v1 = vmul.f32 %v1068_v4, %v423_v0 }
 0x105   :  { %581 = vxpose.xlu2.b32.cont [15/16] %v497_v1, 128 }
 0x107   :  { %v344_v19 = vpop.f32.mrf.mxu3 }
 0x108   :  { %v297_v5 = vpop.f32.mrf.mxu2  ;;  %v404_v35 = vmax.f32 %v344_v19, 0.0 }
 0x109   :  { %599 = vxpose.xlu0.b32.start [1/16] %v442_v48, 128  ;;  %v427_v6 = vmax.f32 %v297_v5, 0.0 }
 0x10a   :  { %v478_v37 = vmul.f32 %v1113_v46, %v404_v35 }
 0x10b   :  { %v501_v8 = vmul.f32 %v1068_v4, %v427_v6  ;;  %v470_v4 = vmul.f32 %v1113_v46, %v396_v18 }
 0x10d   :  { %582 = vxpose.xlu2.b32.end [16/16] %v501_v8, 128 }
 0x10f   :  { %v347_v30 = vpop.f32.mrf.mxu3 }
 0x110   :  { %v408_v41 = vmax.f32 %v347_v30, 0.0 }
 0x111   :  { %600 = vxpose.xlu0.b32.cont [2/16] %v446_v53, 128 }
 0x112   :  { %v482_v42 = vmul.f32 %v1113_v46, %v408_v41 }
 0x117   :  { %v350_v40 = vpop.f32.mrf.mxu3 }
 0x118   :  { %v412_v48 = vmax.f32 %v350_v40, 0.0 }
 0x119   :  { %601 = vxpose.xlu0.b32.cont [3/16] %v450_v56, 128 }
 0x11a   :  { %v486_v49 = vmul.f32 %v1113_v46, %v412_v48 }
 0x11f   :  { %v353_v47 = vpop.f32.mrf.mxu3 }
 0x120   :  { %v416_v52 = vmax.f32 %v353_v47, 0.0 }
 0x121   :  { %602 = vxpose.xlu0.b32.cont [4/16] %v454_v62, 128 }
 0x122   :  { %v490_v54 = vmul.f32 %v1113_v46, %v416_v52 }
 0x127   :  { %v356_v28 = vpop.f32.mrf.mxu3 }
 0x128   :  { %v420_v55 = vmax.f32 %v356_v28, 0.0 }
 0x129   :  { %603 = vxpose.xlu0.b32.cont [5/16] %v458_v2, 128 }
 0x12a   :  { %v494_v59 = vmul.f32 %v1113_v46, %v420_v55 }
 0x12d   :  { %v519_v10 = vpop.trf.xlu0 }
 0x12e   :  { %v1128_v11 = vpop.trf.xlu1  ;;  %v1140_v24 = vpop.trf.xlu2 }
 0x12f   :  { %v359_v58 = vpop.f32.mrf.mxu3 }
 0x130   :  { %v424_v62 = vmax.f32 %v359_v58, 0.0 }
 0x131   :  { %604 = vxpose.xlu0.b32.cont [6/16] %v462_v9, 128 }
 0x132   :  { %v498_v0 = vmul.f32 %v1113_v46, %v424_v62 }
 0x135   :  { %v520_v15 = vpop.trf.xlu0 }
 0x136   :  { %v631_v16 = vadd.f32 %v520_v15, %v519_v10  ;;  %v1131_v17 = vpop.trf.xlu1  ;;  %v1145_v25 = vpop.trf.xlu2 }
 0x137   :  { %v362_v3 = vpop.f32.mrf.mxu3 }
 0x138   :  { %v428_v5 = vmax.f32 %v362_v3, 0.0 }
 0x139   :  { %605 = vxpose.xlu0.b32.cont [7/16] %v466_v14, 128 }
 0x13a   :  { %v502_v6 = vmul.f32 %v1113_v46, %v428_v5 }
 0x13d   :  { %v521_v20 = vpop.trf.xlu0 }
 0x13e   :  { %v632_v21 = vadd.f32 %v631_v16, %v521_v20  ;;  %v1134_v22 = vpop.trf.xlu1  ;;  %v1148_v53 = vpop.trf.xlu2 }
 0x141   :  { %606 = vxpose.xlu0.b32.cont [8/16] %v470_v4, 128 }
 0x145   :  { %v522_v33 = vpop.trf.xlu0 }
 0x146   :  { %v633_v34 = vadd.f32 %v632_v21, %v522_v33  ;;  %v1137_v36 = vpop.trf.xlu1  ;;  %v1151_v57 = vpop.trf.xlu2 }
 0x149   :  { %607 = vxpose.xlu0.b32.cont [9/16] %v474_v31, 128 }
 0x14d   :  { %v523_v38 = vpop.trf.xlu0 }
 0x14e   :  { %v634_v39 = vadd.f32 %v633_v34, %v523_v38  ;;  %v1143_v44 = vpop.trf.xlu1  ;;  %v587_v1 = vpop.trf.xlu2 }
 0x151   :  { %608 = vxpose.xlu0.b32.cont [10/16] %v478_v37, 128 }
 0x155   :  { %v524_v43 = vpop.trf.xlu0 }
 0x156   :  { %v635_v45 = vadd.f32 %v634_v39, %v524_v43  ;;  %v556_v29 = vpop.trf.xlu1  ;;  %v588_v9 = vpop.trf.xlu2 }
 0x159   :  { %609 = vxpose.xlu0.b32.cont [11/16] %v482_v42, 128 }
 0x15d   :  { %v525_v50 = vpop.trf.xlu0 }
 0x15e   :  { %v636_v51 = vadd.f32 %v635_v45, %v525_v50  ;;  %v557_v56 = vpop.trf.xlu1  ;;  %v589_v13 = vpop.trf.xlu2 }
 0x161   :  { %610 = vxpose.xlu0.b32.cont [12/16] %v486_v49, 128 }
 0x165   :  { %v526_v32 = vpop.trf.xlu0 }
 0x166   :  { %v637_v26 = vadd.f32 %v636_v51, %v526_v32  ;;  %v558_v63 = vpop.trf.xlu1  ;;  %v590_v16 = vpop.trf.xlu2 }
 0x169   :  { %611 = vxpose.xlu0.b32.cont [13/16] %v490_v54, 128 }
 0x16d   :  { %v527_v60 = vpop.trf.xlu0 }
 0x16e   :  { %v638_v61 = vadd.f32 %v637_v26, %v527_v60  ;;  %v559_v8 = vpop.trf.xlu1  ;;  %v591_v21 = vpop.trf.xlu2 }
 0x171   :  { %612 = vxpose.xlu0.b32.cont [14/16] %v494_v59, 128 }
 0x175   :  { %v528_v27 = vpop.trf.xlu0 }
 0x176   :  { %v639_v2 = vadd.f32 %v638_v61, %v528_v27  ;;  %v560_v12 = vpop.trf.xlu1  ;;  %v592_v37 = vpop.trf.xlu2 }
 0x179   :  { %613 = vxpose.xlu0.b32.cont [15/16] %v498_v0, 128 }
 0x17d   :  { %v529_v7 = vpop.trf.xlu0 }
 0x17e   :  { %v561_v15 = vpop.trf.xlu1  ;;  %v640_v4 = vadd.f32 %v639_v2, %v529_v7  ;;  %v593_v47 = vpop.trf.xlu2 }
 0x181   :  { %614 = vxpose.xlu0.b32.end [16/16] %v502_v6, 128 }
 0x185   :  { %v530_v10 = vpop.trf.xlu0 }
 0x186   :  { %v562_v19 = vpop.trf.xlu1  ;;  %v641_v23 = vadd.f32 %v640_v4, %v530_v10  ;;  %v594_v32 = vpop.trf.xlu2 }
 0x18d   :  { %v531_v14 = vpop.trf.xlu0 }
 0x18e   :  { %v642_v30 = vadd.f32 %v641_v23, %v531_v14  ;;  %v563_v34 = vpop.trf.xlu1  ;;  %v595_v60 = vpop.trf.xlu2 }
 0x195   :  { %v532_v18 = vpop.trf.xlu0 }
 0x196   :  { %v643_v31 = vadd.f32 %v642_v30, %v532_v18  ;;  %v564_v43 = vpop.trf.xlu1  ;;  %v596_v0 = vpop.trf.xlu2 }
 0x19d   :  { %v533_v20 = vpop.trf.xlu0 }
 0x19e   :  { %v644_v33 = vadd.f32 %v643_v31, %v533_v20  ;;  %v565_v28 = vpop.trf.xlu1 }
 0x1a5   :  { %v534_v46 = vpop.trf.xlu0 }
 0x1a6   :  { %v645_v35 = vadd.f32 %v644_v33, %v534_v46  ;;  %v566_v58 = vpop.trf.xlu1 }
 0x1a8   :  { %v646_v38 = vadd.f32 %v645_v35, %v1128_v11 }
 0x1aa   :  { %v647_v39 = vadd.f32 %v646_v38, %v1131_v17 }
 0x1ac   :  { %v648_v40 = vadd.f32 %v647_v39, %v1134_v22 }
 0x1ad   :  { %v615_v41 = vpop.trf.xlu0 }
 0x1ae   :  { %v649_v42 = vadd.f32 %v648_v40, %v1137_v36 }
 0x1b0   :  { %v650_v45 = vadd.f32 %v649_v42, %v1143_v44 }
 0x1b2   :  { %v651_v48 = vadd.f32 %v650_v45, %v556_v29 }
 0x1b4   :  { %v652_v49 = vadd.f32 %v651_v48, %v557_v56 }
 0x1b5   :  { %v616_v50 = vpop.trf.xlu0 }
 0x1b6   :  { %v653_v51 = vadd.f32 %v652_v49, %v558_v63 }
 0x1b8   :  { %v654_v52 = vadd.f32 %v653_v51, %v559_v8  ;;  %v597_v8 = vpop.trf.xlu2 }
 0x1ba   :  { %v655_v54 = vadd.f32 %v654_v52, %v560_v12 }
 0x1bc   :  { %v656_v11 = vadd.f32 %v655_v54, %v561_v15 }
 0x1bd   :  { %v617_v26 = vpop.trf.xlu0 }
 0x1be   :  { %v657_v17 = vadd.f32 %v656_v11, %v562_v19 }
 0x1c0   :  { %v658_v55 = vadd.f32 %v657_v17, %v563_v34 }
 0x1c2   :  { %v659_v22 = vadd.f32 %v658_v55, %v564_v43 }
 0x1c4   :  { %v660_v59 = vadd.f32 %v659_v22, %v565_v28 }
 0x1c5   :  { %v618_v36 = vpop.trf.xlu0 }
 0x1c6   :  { %v661_v61 = vadd.f32 %v660_v59, %v566_v58 }
 0x1c8   :  { %v662_v44 = vadd.f32 %v661_v61, %v1140_v24 }
 0x1ca   :  { %v663_v29 = vadd.f32 %v662_v44, %v1145_v25  ;;  %v598_v25 = vpop.trf.xlu2 }
 0x1cc   :  { %v664_v56 = vadd.f32 %v663_v29, %v1148_v53 }
 0x1cd   :  { %v619_v62 = vpop.trf.xlu0 }
 0x1ce   :  { %v665_v63 = vadd.f32 %v664_v56, %v1151_v57 }
 0x1d0   :  { %v666_v27 = vadd.f32 %v665_v63, %v587_v1 }
 0x1d2   :  { %v667_v2 = vadd.f32 %v666_v27, %v588_v9 }
 0x1d4   :  { %v668_v3 = vadd.f32 %v667_v2, %v589_v13 }
 0x1d5   :  { %v620_v5 = vpop.trf.xlu0 }
 0x1d6   :  { %v669_v6 = vadd.f32 %v668_v3, %v590_v16 }
 0x1d8   :  { %v670_v7 = vadd.f32 %v669_v6, %v591_v21 }
 0x1da   :  { %v671_v10 = vadd.f32 %v670_v7, %v592_v37 }
 0x1dc   :  { %v672_v12 = vadd.f32 %v671_v10, %v593_v47 }
 0x1dd   :  { %v621_v14 = vpop.trf.xlu0 }
 0x1de   :  { %v673_v15 = vadd.f32 %v672_v12, %v594_v32 }
 0x1e0   :  { %v674_v24 = vadd.f32 %v673_v15, %v595_v60 }
 0x1e2   :  { %v675_v18 = vadd.f32 %v674_v24, %v596_v0 }
 0x1e4   :  { %v676_v19 = vadd.f32 %v675_v18, %v597_v8 }
 0x1e5   :  { %v622_v53 = vpop.trf.xlu0 }
 0x1e6   :  { %v677_v4 = vadd.f32 %v676_v19, %v598_v25 }
 0x1e8   :  { %v678_v20 = vadd.f32 %v677_v4, %v615_v41 }
 0x1ea   :  { %v679_v57 = vadd.f32 %v678_v20, %v616_v50 }
 0x1ec   :  { %v680_v23 = vadd.f32 %v679_v57, %v617_v26 }
 0x1ed   :  { %v623_v1 = vpop.trf.xlu0 }
 0x1ee   :  { %v681_v9 = vadd.f32 %v680_v23, %v618_v36 }
 0x1f0   :  { %v682_v13 = vadd.f32 %v681_v9, %v619_v62 }
 0x1f2   :  { %v683_v31 = vadd.f32 %v682_v13, %v620_v5 }
 0x1f4   :  { %v684_v46 = vadd.f32 %v683_v31, %v621_v14 }
 0x1f5   :  { %v624_v30 = vpop.trf.xlu0 }
 0x1f6   :  { %v685_v34 = vadd.f32 %v684_v46, %v622_v53 }
 0x1f8   :  { %v686_v37 = vadd.f32 %v685_v34, %v623_v1 }
 0x1fa   :  { %v687_v38 = vadd.f32 %v686_v37, %v624_v30 }
 0x1fd   :  { %v625_v16 = vpop.trf.xlu0 }
 0x1fe   :  { %v688_v39 = vadd.f32 %v687_v38, %v625_v16 }
 0x205   :  { %v626_v21 = vpop.trf.xlu0 }
 0x206   :  { %v689_v42 = vadd.f32 %v688_v39, %v626_v21 }
 0x20d   :  { %v627_v33 = vpop.trf.xlu0 }
 0x20e   :  { %v690_v43 = vadd.f32 %v689_v42, %v627_v33 }
 0x215   :  { %v628_v35 = vpop.trf.xlu0 }
 0x216   :  { %v691_v41 = vadd.f32 %v690_v43, %v628_v35 }
 0x21d   :  { %v629_v40 = vpop.trf.xlu0 }
 0x21e   :  { %v692_v45 = vadd.f32 %v691_v41, %v629_v40 }
 0x225   :  { %v630_v47 = vpop.trf.xlu0 }
 0x226   :  { %v693_v48 = vadd.f32 %v692_v45, %v630_v47 }
 0x228   :  { %v694_v49 = vrot.slane %v693_v48, 4 }
 0x22a   :  { %v695_v50 = vadd.f32 %v694_v49, %v693_v48 }
 0x22c   :  { %v696_v51 = vrot.slane %v695_v50, 2 }
 0x22e   :  { %v697_v52 = vadd.f32 %v696_v51, %v695_v50 }
 0x230   :  { %v698_v28 = vrot.slane %v697_v52, 1 }
 0x232   :  { %v699_v54 = vadd.f32 %v698_v28, %v697_v52 }
 0x234   :  { %700 = vst [vmem:[#allocation2] sm:$0x1] %v699_v54 }
 0x235   :  { %711 = dma.vmem_to_hbm [thread:$0]  %s707_s2, 16, %s709_s17, [#allocation3]  }
 0x236   :  { %810 = dma.done.wait [#allocation3], 16  }
 0x237   :  { %811 = vsyncadd [#allocation3], 4294967280 }
 0x238   :  { %716 = vsyncpa [#allocation3], 1 }

</bundles_post_ra>
